<compile_context>
chip_gen: v6e
topology: v6e:2x2x1
jax: 0.10.0
libtpu: 0.0.40
codegen_flags: <defaults>
</compile_context>

<pallas_src>
import jax
import jax.numpy as jnp
import numpy as np
from jax.experimental import pallas as pl
from jax.experimental.pallas import tpu as pltpu

HIDDEN = 100
OUT = 10
PAD = 128  # lane-dense padded width for all hidden/output dims


def dnn_kernel(x_ref, w1_ref, wst_ref, b_ref, o_ref):
    """Fused 6-layer MLP: 5x (Linear -> ReLU [-> Dropout==identity]) + Linear.

    x_ref  : (tb, F)        bf16 activation tile
    w1_ref : (F, 128)       bf16 first-layer weight (hidden padded 100 -> 128)
    wst_ref: (5, 128, 128)  bf16 stacked weights for layers 2..6 (padded)
    b_ref  : (6, 128)       f32 stacked biases (padded)
    o_ref  : (tb, 128)      f32 lane-dense output tile (cols >= 10 are padding)
    """
    b = b_ref[...]            # read all biases once: (6, 128) f32
    cdt = w1_ref.dtype        # compute dtype for the MXU (bf16)

    # Layer 1: Linear -> ReLU  (Dropout(0.5) == identity in eval mode)
    y = jnp.dot(x_ref[...], w1_ref[...],
                preferred_element_type=jnp.float32) + b[0:1, :]
    h = jnp.maximum(y, 0.0)

    # Layers 2..5: Linear -> ReLU
    for i in range(4):
        y = jnp.dot(h.astype(cdt), wst_ref[i],
                    preferred_element_type=jnp.float32) + b[i + 1:i + 2, :]
        h = jnp.maximum(y, 0.0)

    # Output layer (no ReLU)
    y = jnp.dot(h.astype(cdt), wst_ref[4],
                preferred_element_type=jnp.float32) + b[5:6, :]
    o_ref[...] = y.astype(o_ref.dtype)


def pack_params(params, compute_dtype=jnp.bfloat16):
    """Pad all layer widths to 128 and stack. params: 6 (w, b) pairs with
    w: (in, out), b: (out,) in float32 (PyTorch nn.Linear convention, transposed)."""
    w1, _ = params[0]
    F = w1.shape[0]
    w1p = jnp.zeros((F, PAD), compute_dtype).at[:, :w1.shape[1]].set(
        w1.astype(compute_dtype))
    wst = []
    for w, _ in params[1:]:
        wp = jnp.zeros((PAD, PAD), compute_dtype)
        wp = wp.at[:w.shape[0], :w.shape[1]].set(w.astype(compute_dtype))
        wst.append(wp)
    wst = jnp.stack(wst)                                    # (5, 128, 128)
    bs = []
    for _, bb in params:
        bp = jnp.zeros((PAD,), jnp.float32).at[:bb.shape[-1]].set(
            bb.reshape(-1).astype(jnp.float32))
        bs.append(bp)
    bstk = jnp.stack(bs)                                    # (6, 128) f32
    return w1p, wst, bstk


def _pick_tb(B, F, act_bytes, vmem_budget=24 << 20, tb_cap=1024):
    """Largest batch tile (multiple of 8, <= tb_cap) whose double-buffered
    x tile + output tile fit in `vmem_budget` (safe on v5e/v6e/v7x)."""
    per_row = 2 * F * act_bytes + 2 * PAD * 4
    tb = max(8, min(tb_cap, vmem_budget // max(per_row, 1)))
    tb = (tb // 8) * 8
    bp8 = ((B + 7) // 8) * 8
    return max(8, min(tb, bp8))


def dnn_forward(x, params, compute_dtype=jnp.bfloat16, tb=None):
    """x: (B, num_features) f32. params: list of 6 (w, b) with w:(in,out), b:(out,)."""
    B, F = x.shape
    act_bytes = jnp.dtype(compute_dtype).itemsize
    w1p, wst, bstk = pack_params(params, compute_dtype)

    if tb is None:
        tb = _pick_tb(B, F, act_bytes)
    grid = pl.cdiv(B, tb)
    Bp = grid * tb

    xc = x.astype(compute_dtype)
    if Bp != B:
        xc = jnp.pad(xc, ((0, Bp - B), (0, 0)))  # only pad the ragged last tile

    flops = 2 * Bp * (F * PAD + 5 * PAD * PAD)
    bytes_accessed = (Bp * F * act_bytes
                      + w1p.size * act_bytes + wst.size * act_bytes
                      + bstk.size * 4
                      + Bp * PAD * 4)
    vmem_est = (2 * tb * F * act_bytes          # double-buffered x tile
                + 2 * tb * PAD * 4              # double-buffered out tile
                + w1p.size * act_bytes + wst.size * act_bytes + bstk.size * 4
                + (2 << 20))                    # slack
    vmem_limit = min(max(int(vmem_est), 32 << 20), 64 << 20)

    out = pl.pallas_call(
        dnn_kernel,
        out_shape=jax.ShapeDtypeStruct((Bp, PAD), jnp.float32),
        grid=(grid,),
        in_specs=[
            pl.BlockSpec((tb, F), lambda i: (i, 0)),          # x tile
            pl.BlockSpec(w1p.shape, lambda i: (0, 0)),        # W1 (resident)
            pl.BlockSpec(wst.shape, lambda i: (0, 0, 0)),     # W2..W6 stacked
            pl.BlockSpec(bstk.shape, lambda i: (0, 0)),       # biases stacked
        ],
        out_specs=pl.BlockSpec((tb, PAD), lambda i: (i, 0)),
        compiler_params=pltpu.CompilerParams(
            dimension_semantics=("parallel",),
            vmem_limit_bytes=vmem_limit),
        cost_estimate=pl.CostEstimate(
            flops=flops, transcendentals=0, bytes_accessed=bytes_accessed),
    )(xc, w1p, wst, bstk)

    return out[:B, :OUT]


def init_params(num_features, key):
    """Deterministic init mirroring nn.Linear default (uniform +/- 1/sqrt(fan_in))."""
    dims = [num_features, HIDDEN, HIDDEN, HIDDEN, HIDDEN, HIDDEN, OUT]
    params = []
    for i in range(6):
        fan_in, fan_out = dims[i], dims[i + 1]
        key, kw, kb = jax.random.split(key, 3)
        bound = 1.0 / np.sqrt(fan_in)
        w = jax.random.uniform(kw, (fan_in, fan_out), jnp.float32, -bound, bound)
        b = jax.random.uniform(kb, (fan_out,), jnp.float32, -bound, bound)
        params.append((w, b))
    return params


def dnn_reference(x, params):
    h = x
    for i, (w, b) in enumerate(params):
        h = h @ w + b
        if i < 5:
            h = jnp.maximum(h, 0.0)
    return h


if __name__ == "__main__":
    key = jax.random.PRNGKey(0)
    k_x, k_p = jax.random.split(key)

    batch = 64
    num_features = 32  # small synthetic feature count (CIFAR-10 flattened would be 3072)
    x = jax.random.normal(k_x, (batch, num_features), jnp.float32)
    params = init_params(num_features, k_p)

    out = dnn_forward(x, params)
    out = jax.block_until_ready(out)

    # f32 reference using the same bf16-rounded inputs/weights the kernel consumes.
    params_bf = [(w.astype(jnp.bfloat16).astype(jnp.float32), b) for (w, b) in params]
    ref = dnn_reference(x.astype(jnp.bfloat16).astype(jnp.float32), params_bf)
    np.testing.assert_allclose(np.asarray(out), np.asarray(ref), rtol=2e-2, atol=2e-2)

    assert out.shape == (batch, OUT)
    print("KERNEL_OK")
</pallas_src>

<mosaic_0001>
module attributes {stable_mosaic.version = 11 : i64} {
  func.func @dnn_kernel(%arg0: i32, %arg1: memref<64x32xbf16, #tpu.memory_space<vmem>>, %arg2: memref<32x128xbf16, #tpu.memory_space<vmem>>, %arg3: memref<5x128x128xbf16, #tpu.memory_space<vmem>>, %arg4: memref<6x128xf32, #tpu.memory_space<vmem>>, %arg5: memref<64x128xf32, #tpu.memory_space<vmem>>) attributes {dimension_semantics = [#tpu.dimension_semantics<parallel>], iteration_bounds = array<i64: 1>, scalar_prefetch = 0 : i64, scratch_operands = 0 : i64, tpu.core_type = #tpu.core_type<tc>, window_params = [{transform_indices = @transform_0, window_bounds = array<i64: 64, 32>}, {pipeline_mode = #tpu.pipeline_mode<synchronous>, transform_indices = @transform_1, window_bounds = array<i64: 32, 128>}, {pipeline_mode = #tpu.pipeline_mode<synchronous>, transform_indices = @transform_2, window_bounds = array<i64: 5, 128, 128>}, {pipeline_mode = #tpu.pipeline_mode<synchronous>, transform_indices = @transform_3, window_bounds = array<i64: 6, 128>}, {transform_indices = @transform_4, window_bounds = array<i64: 64, 128>}]} {
    %c0 = arith.constant 0 : index
    %c0_0 = arith.constant 0 : index
    %0 = vector.load %arg4[%c0, %c0_0] : memref<6x128xf32, #tpu.memory_space<vmem>>, vector<6x128xf32>
    %c0_1 = arith.constant 0 : index
    %c0_2 = arith.constant 0 : index
    %1 = vector.load %arg1[%c0_1, %c0_2] : memref<64x32xbf16, #tpu.memory_space<vmem>>, vector<64x32xbf16>
    %c0_3 = arith.constant 0 : index
    %c0_4 = arith.constant 0 : index
    %2 = vector.load %arg2[%c0_3, %c0_4] : memref<32x128xbf16, #tpu.memory_space<vmem>>, vector<32x128xbf16>
    %cst = arith.constant dense<0.000000e+00> : vector<64x128xf32>
    %3 = tpu.matmul %1, %2, %cst {dimension_numbers = #tpu.dot_dimension_numbers<[1], [0], [0], [1], [0, 0, 1, 1], [], []>} : vector<64x32xbf16>, vector<32x128xbf16>, vector<64x128xf32> -> vector<64x128xf32>
    %4 = vector.extract_strided_slice %0 {offsets = [0, 0], sizes = [1, 128], strides = [1, 1]} : vector<6x128xf32> to vector<1x128xf32>
    %5 = vector.broadcast %4 : vector<1x128xf32> to vector<64x128xf32>
    %6 = arith.addf %3, %5 : vector<64x128xf32>
    %cst_5 = arith.constant 0.000000e+00 : f32
    %7 = vector.broadcast %cst_5 : f32 to vector<64x128xf32>
    %8 = arith.maximumf %6, %7 : vector<64x128xf32>
    %9 = arith.truncf %8 : vector<64x128xf32> to vector<64x128xbf16>
    %c0_6 = arith.constant 0 : index
    %c0_7 = arith.constant 0 : index
    %c0_8 = arith.constant 0 : index
    %10 = vector.load %arg3[%c0_6, %c0_7, %c0_8] : memref<5x128x128xbf16, #tpu.memory_space<vmem>>, vector<1x128x128xbf16>
    %11 = vector.shape_cast %10 : vector<1x128x128xbf16> to vector<128x128xbf16>
    %cst_9 = arith.constant dense<0.000000e+00> : vector<64x128xf32>
    %12 = tpu.matmul %9, %11, %cst_9 {dimension_numbers = #tpu.dot_dimension_numbers<[1], [0], [0], [1], [0, 0, 1, 1], [], []>} : vector<64x128xbf16>, vector<128x128xbf16>, vector<64x128xf32> -> vector<64x128xf32>
    %13 = vector.extract_strided_slice %0 {offsets = [1, 0], sizes = [1, 128], strides = [1, 1]} : vector<6x128xf32> to vector<1x128xf32>
    %14 = vector.broadcast %13 : vector<1x128xf32> to vector<64x128xf32>
    %15 = arith.addf %12, %14 : vector<64x128xf32>
    %cst_10 = arith.constant 0.000000e+00 : f32
    %16 = vector.broadcast %cst_10 : f32 to vector<64x128xf32>
    %17 = arith.maximumf %15, %16 : vector<64x128xf32>
    %18 = arith.truncf %17 : vector<64x128xf32> to vector<64x128xbf16>
    %c1 = arith.constant 1 : index
    %c0_11 = arith.constant 0 : index
    %c0_12 = arith.constant 0 : index
    %19 = vector.load %arg3[%c1, %c0_11, %c0_12] : memref<5x128x128xbf16, #tpu.memory_space<vmem>>, vector<1x128x128xbf16>
    %20 = vector.shape_cast %19 : vector<1x128x128xbf16> to vector<128x128xbf16>
    %cst_13 = arith.constant dense<0.000000e+00> : vector<64x128xf32>
    %21 = tpu.matmul %18, %20, %cst_13 {dimension_numbers = #tpu.dot_dimension_numbers<[1], [0], [0], [1], [0, 0, 1, 1], [], []>} : vector<64x128xbf16>, vector<128x128xbf16>, vector<64x128xf32> -> vector<64x128xf32>
    %22 = vector.extract_strided_slice %0 {offsets = [2, 0], sizes = [1, 128], strides = [1, 1]} : vector<6x128xf32> to vector<1x128xf32>
    %23 = vector.broadcast %22 : vector<1x128xf32> to vector<64x128xf32>
    %24 = arith.addf %21, %23 : vector<64x128xf32>
    %cst_14 = arith.constant 0.000000e+00 : f32
    %25 = vector.broadcast %cst_14 : f32 to vector<64x128xf32>
    %26 = arith.maximumf %24, %25 : vector<64x128xf32>
    %27 = arith.truncf %26 : vector<64x128xf32> to vector<64x128xbf16>
    %c2 = arith.constant 2 : index
    %c0_15 = arith.constant 0 : index
    %c0_16 = arith.constant 0 : index
    %28 = vector.load %arg3[%c2, %c0_15, %c0_16] : memref<5x128x128xbf16, #tpu.memory_space<vmem>>, vector<1x128x128xbf16>
    %29 = vector.shape_cast %28 : vector<1x128x128xbf16> to vector<128x128xbf16>
    %cst_17 = arith.constant dense<0.000000e+00> : vector<64x128xf32>
    %30 = tpu.matmul %27, %29, %cst_17 {dimension_numbers = #tpu.dot_dimension_numbers<[1], [0], [0], [1], [0, 0, 1, 1], [], []>} : vector<64x128xbf16>, vector<128x128xbf16>, vector<64x128xf32> -> vector<64x128xf32>
    %31 = vector.extract_strided_slice %0 {offsets = [3, 0], sizes = [1, 128], strides = [1, 1]} : vector<6x128xf32> to vector<1x128xf32>
    %32 = vector.broadcast %31 : vector<1x128xf32> to vector<64x128xf32>
    %33 = arith.addf %30, %32 : vector<64x128xf32>
    %cst_18 = arith.constant 0.000000e+00 : f32
    %34 = vector.broadcast %cst_18 : f32 to vector<64x128xf32>
    %35 = arith.maximumf %33, %34 : vector<64x128xf32>
    %36 = arith.truncf %35 : vector<64x128xf32> to vector<64x128xbf16>
    %c3 = arith.constant 3 : index
    %c0_19 = arith.constant 0 : index
    %c0_20 = arith.constant 0 : index
    %37 = vector.load %arg3[%c3, %c0_19, %c0_20] : memref<5x128x128xbf16, #tpu.memory_space<vmem>>, vector<1x128x128xbf16>
    %38 = vector.shape_cast %37 : vector<1x128x128xbf16> to vector<128x128xbf16>
    %cst_21 = arith.constant dense<0.000000e+00> : vector<64x128xf32>
    %39 = tpu.matmul %36, %38, %cst_21 {dimension_numbers = #tpu.dot_dimension_numbers<[1], [0], [0], [1], [0, 0, 1, 1], [], []>} : vector<64x128xbf16>, vector<128x128xbf16>, vector<64x128xf32> -> vector<64x128xf32>
    %40 = vector.extract_strided_slice %0 {offsets = [4, 0], sizes = [1, 128], strides = [1, 1]} : vector<6x128xf32> to vector<1x128xf32>
    %41 = vector.broadcast %40 : vector<1x128xf32> to vector<64x128xf32>
    %42 = arith.addf %39, %41 : vector<64x128xf32>
    %cst_22 = arith.constant 0.000000e+00 : f32
    %43 = vector.broadcast %cst_22 : f32 to vector<64x128xf32>
    %44 = arith.maximumf %42, %43 : vector<64x128xf32>
    %45 = arith.truncf %44 : vector<64x128xf32> to vector<64x128xbf16>
    %c4 = arith.constant 4 : index
    %c0_23 = arith.constant 0 : index
    %c0_24 = arith.constant 0 : index
    %46 = vector.load %arg3[%c4, %c0_23, %c0_24] : memref<5x128x128xbf16, #tpu.memory_space<vmem>>, vector<1x128x128xbf16>
    %47 = vector.shape_cast %46 : vector<1x128x128xbf16> to vector<128x128xbf16>
    %cst_25 = arith.constant dense<0.000000e+00> : vector<64x128xf32>
    %48 = tpu.matmul %45, %47, %cst_25 {dimension_numbers = #tpu.dot_dimension_numbers<[1], [0], [0], [1], [0, 0, 1, 1], [], []>} : vector<64x128xbf16>, vector<128x128xbf16>, vector<64x128xf32> -> vector<64x128xf32>
    %49 = vector.extract_strided_slice %0 {offsets = [5, 0], sizes = [1, 128], strides = [1, 1]} : vector<6x128xf32> to vector<1x128xf32>
    %50 = vector.broadcast %49 : vector<1x128xf32> to vector<64x128xf32>
    %51 = arith.addf %48, %50 : vector<64x128xf32>
    %c0_26 = arith.constant 0 : index
    %c0_27 = arith.constant 0 : index
    %52 = vector.load %arg5[%c0_26, %c0_27] : memref<64x128xf32, #tpu.memory_space<vmem>>, vector<64x128xf32>
    tpu.vector_store %arg5[%c0_26, %c0_27], %51 {strides = array<i32>} : memref<64x128xf32, #tpu.memory_space<vmem>>, vector<64x128xf32>,
    return
  }
  func.func @transform_0(%arg0: i32) -> (i32, i32) {
    %c0_i32 = arith.constant 0 : i32
    %c0_i32_0 = arith.constant 0 : i32
    return %arg0, %c0_i32 : i32, i32
  }
  func.func @transform_1(%arg0: i32) -> (i32, i32) {
    %c0_i32 = arith.constant 0 : i32
    %c0_i32_0 = arith.constant 0 : i32
    %c0_i32_1 = arith.constant 0 : i32
    return %c0_i32, %c0_i32_0 : i32, i32
  }
  func.func @transform_2(%arg0: i32) -> (i32, i32, i32) {
    %c0_i32 = arith.constant 0 : i32
    %c0_i32_0 = arith.constant 0 : i32
    %c0_i32_1 = arith.constant 0 : i32
    %c0_i32_2 = arith.constant 0 : i32
    return %c0_i32, %c0_i32_0, %c0_i32_1 : i32, i32, i32
  }
  func.func @transform_3(%arg0: i32) -> (i32, i32) {
    %c0_i32 = arith.constant 0 : i32
    %c0_i32_0 = arith.constant 0 : i32
    %c0_i32_1 = arith.constant 0 : i32
    return %c0_i32, %c0_i32_0 : i32, i32
  }
  func.func @transform_4(%arg0: i32) -> (i32, i32) {
    %c0_i32 = arith.constant 0 : i32
    %c0_i32_0 = arith.constant 0 : i32
    return %arg0, %c0_i32 : i32, i32
  }
}

</mosaic_0001>

<bundles_post_ra>
// kernel: tpu_custom_call.1
= control target key start
LH: loop header
LB: loop body
LE: loop exit
PB: predicated region body
PF: predicated region fallthrough
CT: control target
= control target key end

     0   :  { %9 = vsyncpa [#allocation3], 0  ;;  %s1336_s0 = inlined_call_operand.vmem [shape: bf16[64,32], index: 0, kind: input, shape index: {}]   ;;  %s1337_s1 = inlined_call_operand.vmem [shape: bf16[32,128], index: 1, kind: input, shape index: {}]   ;;  %s1338_s2 = inlined_call_operand.hbm [shape: bf16[5,128,128], index: 2, kind: input, shape index: {}]   ;;  %s1339_s3 = inlined_call_operand.vmem [shape: f32[6,128], index: 3, kind: input, shape index: {}]   ;;  %s1340_s4 = inlined_call_operand.hbm [shape: f32[64,128], index: 4, kind: output, shape index: {}]  }
   0x1   :  { %10 = vsyncpa [#allocation4], 0  ;;  %s1258_s15 = smov [#allocation2]  }
   0x2   :  { %s20_s16 = sshll.u32 %s1258_s15, 4  ;;  %s21_s16 = int_to_ptr.vmem [resolvable:$true] %s20_s16 }
   0x3   :  { %s1222_s17 = scalar_lea.vmem %s21_s16, 5120  ;;  %p1227_p1 = scmp.lt.s32.totalorder %s21_s16, %s21_s16 }
   0x4   :  { %p1223_p0 = scmp.ne.s32.totalorder %s21_s16, %s1222_s17  ;;  %p1228_p2 = scmp.lt.s32.totalorder %s1222_s17, %s1222_s17 }
   0x6   :  { %p1229_p3 = por %p1228_p2, %p1227_p1 }
   0x8   :  { %p1230_p4 = pnand %p1229_p3, %p1223_p0 }
   0xa   :  { %1233 = shalt.err (!%p1230_p4)
}
   0xb   :  { %s1259_s18 = smov 64   ;;  %s1260_s19 = smov 4  }
   0xc   :  { %26 = dma.hbm_to_vmem [thread:$0]  %s1338_s2, 5120, %s21_s16, [#allocation3], %s1259_s18, %s1259_s18, %s1260_s19  }
   0xd   :  { %1254 = dma.done.wait [#allocation3], 5120  }
   0xe   :  { %1255 = vsyncadd [#allocation3], 4294962176  ;;  %v1168_v0 = vld [vmem:[%s1337_s1 + $0x8] sm:$0xff]   ;;  %v1169_v1 = vld [vmem:[%s1337_s1] sm:$0xff]   ;;  %vm82_vm0 = vcmask 261120   ;;  %v46_v19 = vlaneseq }
   0xf   :  { %1030 = vmatprep.subr.bf16.mxu0 %v1168_v0  ;;  %v1170_v2 = vld [vmem:[%s1336_s0] sm:$0xff]   ;;  %v1171_v3 = vld [vmem:[%s1336_s0 + $0x8] sm:$0xff]   ;;  %v1172_v4 = vld [vmem:[%s1336_s0 + $0x10] sm:$0xff]  }
  0x10   :  { %1031 = vmatpush3.bf16.msra.mxu0 %v1168_v0  ;;  %1034 = vmatprep.mubr.msk.bf16.mxu0 %vm82_vm0, %v1170_v2  ;;  %v1174_v5 = vld [vmem:[#allocation2 + $0x38] sm:$0xff]   ;;  %v1175_v6 = vld [vmem:[#allocation2 + $0x30] sm:$0xff]   ;;  %v1176_v7 = vld [vmem:[#allocation2 + $0x28] sm:$0xff]   ;;  %v1314_v20 = vshrl.u32 %v46_v19, 7 }
  0x11   :  { %1032 = vmatprep.subr.bf16.mxu0 %v1169_v1  ;;  %1042 = vmatprep.subr.bf16.mxu1 %v1174_v5  ;;  %v1173_v8 = vld [vmem:[%s1336_s0 + $0x18] sm:$0xff]   ;;  %v1177_v9 = vld [vmem:[#allocation2 + $0x20] sm:$0xff]   ;;  %v1179_v11 = vld [vmem:[#allocation2 + $0x10] sm:$0xff]  }
  0x12   :  { %1043 = vmatpush3.bf16.msra.mxu1 %v1174_v5  ;;  %v1178_v10 = vld [vmem:[#allocation2 + $0x18] sm:$0xff]   ;;  %v1180_v12 = vld [vmem:[#allocation2 + $0x8] sm:$0xff]   ;;  %v1181_v13 = vld [vmem:[#allocation2] sm:$0xff]   ;;  %v48_v21 = vsub.s32 0, %v1314_v20  ;;  %v190_v60 = vsub.s32 1, %v1314_v20 }
  0x13   :  { %1044 = vmatprep.subr.bf16.mxu1 %v1175_v6  ;;  %v1182_v14 = vld [vmem:[#allocation2 + $0x78] sm:$0xff]   ;;  %v1183_v15 = vld [vmem:[#allocation2 + $0x70] sm:$0xff]   ;;  %v1184_v16 = vld [vmem:[#allocation2 + $0x68] sm:$0xff]  }
  0x14   :  { %1033 = vmatpush3.bf16.msra.mxu0 %v1169_v1  ;;  %v1185_v17 = vld [vmem:[#allocation2 + $0x60] sm:$0xff]   ;;  %v1186_v18 = vld [vmem:[#allocation2 + $0x58] sm:$0xff]   ;;  %v1187_v52 = vld [vmem:[#allocation2 + $0x50] sm:$0xff]  }
  0x15   :  { %1066 = vmatprep.subr.bf16.mxu0 %v1182_v14  ;;  %v1320_v22 = vld [vmem:[%s1339_s3] sm:$0x3f]  ;;  %v1188_v53 = vld [vmem:[#allocation2 + $0x48] sm:$0xff]   ;;  %v1190_v55 = vld [vmem:[#allocation2 + $0xb8] sm:$0xff]   ;;  %s1261_s3 = smov [#allocation5]  }
  0x16   :  { %1045 = vmatpush3.bf16.msra.mxu1 %v1175_v6  ;;  %v49_v24 = vrot.slane %v1320_v22, %v48_v21  ;;  %v1189_v54 = vld [vmem:[#allocation2 + $0x40] sm:$0xff]   ;;  %v1191_v56 = vld [vmem:[#allocation2 + $0xb0] sm:$0xff]   ;;  %v1192_v57 = vld [vmem:[#allocation2 + $0xa8] sm:$0xff]   ;;  %v191_v62 = vrot.slane %v1320_v22, %v190_v60  ;;  %s902_s7 = sshll.u32 %s1261_s3, 4  ;;  %s903_s7 = int_to_ptr.vmem [resolvable:$true] %s902_s7 }
  0x17   :  { %1035 = vmatmul.mubr.msk.bf16.vlgmr.msra.gmra.mxu0 %vm82_vm0, %v1171_v3  ;;  %1046 = vmatprep.subr.bf16.mxu1 %v1176_v7  ;;  %v1193_v58 = vld [vmem:[#allocation2 + $0xa0] sm:$0xff]   ;;  %v1194_v59 = vld [vmem:[#allocation2 + $0x98] sm:$0xff]   ;;  %s1234_s8 = scalar_lea.vmem %s903_s7, 1024  ;;  %p1239_p6 = scmp.lt.s32.totalorder %s903_s7, %s903_s7 }
  0x18   :  { %1038 = vmatprep.mubr.msk.bf16.mxu0 %vm82_vm0, %v1172_v4  ;;  %1067 = vmatpush3.bf16.msra.mxu0 %v1182_v14  ;;  %p1235_p5 = scmp.ne.s32.totalorder %s903_s7, %s1234_s8  ;;  %p1240_p7 = scmp.lt.s32.totalorder %s1234_s8, %s1234_s8 }
  0x19   :  { %1068 = vmatprep.subr.bf16.mxu0 %v1183_v15 }
  0x1a   :  { %1047 = vmatpush3.bf16.msra.mxu1 %v1176_v7  ;;  %p1241_p8 = por %p1240_p7, %p1239_p6 }
  0x1b   :  { %1048 = vmatprep.subr.bf16.mxu1 %v1177_v9 }
  0x1c   :  { %1069 = vmatpush3.bf16.msra.mxu0 %v1183_v15  ;;  %p1242_p9 = pnand %p1241_p8, %p1235_p5 }
  0x1d   :  { %1070 = vmatprep.subr.bf16.mxu0 %v1184_v16 }
  0x1e   :  { %1049 = vmatpush3.bf16.msra.mxu1 %v1177_v9 }
  0x1f   :  { %1039 = vmatmul.mubr.msk.bf16.gmra.mxu0 %vm82_vm0, %v1173_v8  ;;  %1050 = vmatprep.subr.bf16.mxu1 %v1178_v10 }
  0x20   :  { %1071 = vmatpush3.bf16.msra.mxu0 %v1184_v16 }
  0x21   :  { %1072 = vmatprep.subr.bf16.mxu0 %v1185_v17 }
  0x22   :  { %1051 = vmatpush3.bf16.msra.mxu1 %v1178_v10 }
  0x23   :  { %1052 = vmatprep.subr.bf16.mxu1 %v1179_v11 }
  0x24   :  { %1073 = vmatpush3.bf16.msra.mxu0 %v1185_v17 }
  0x25   :  { %1074 = vmatprep.subr.bf16.mxu0 %v1186_v18 }
  0x26   :  { %1053 = vmatpush3.bf16.msra.mxu1 %v1179_v11 }
  0x27   :  { %1054 = vmatprep.subr.bf16.mxu1 %v1180_v12 }
  0x28   :  { %1075 = vmatpush3.bf16.msra.mxu0 %v1186_v18 }
  0x29   :  { %1076 = vmatprep.subr.bf16.mxu0 %v1187_v52 }
  0x2a   :  { %1055 = vmatpush3.bf16.msra.mxu1 %v1180_v12 }
  0x2b   :  { %1056 = vmatprep.subr.bf16.mxu1 %v1181_v13 }
  0x2c   :  { %1077 = vmatpush3.bf16.msra.mxu0 %v1187_v52 }
  0x2d   :  { %1078 = vmatprep.subr.bf16.mxu0 %v1188_v53 }
  0x2e   :  { %1057 = vmatpush3.bf16.msra.mxu1 %v1181_v13 }
  0x2f   :  { %1090 = vmatprep.subr.bf16.mxu1 %v1190_v55 }
  0x30   :  { %1079 = vmatpush3.bf16.msra.mxu0 %v1188_v53 }
  0x31   :  { %1080 = vmatprep.subr.bf16.mxu0 %v1189_v54 }
  0x34   :  { %1081 = vmatpush3.bf16.msra.mxu0 %v1189_v54 }
  0xd7   :  { %v1036_v23 = vpop.f32.mrf.mxu0 }
  0xd8   :  { %v138_v29 = vadd.f32 %v1036_v23, %v49_v24 }
  0xd9   :  { %v129_v25 = vpop.f32.mrf.mxu0 }
  0xda   :  { %v130_v27 = vadd.f32 %v129_v25, %v49_v24  ;;  %v162_v36 = vmax.f32 %v138_v29, 0.0  ;;  %v1196_v29 = vld [vmem:[#allocation2 + $0x88] sm:$0xff]  }
  0xdb   :  { %v1037_v26 = vpop.f32.mrf.mxu0 }
  0xdc   :  { %v141_v28 = vadd.f32 %v1037_v26, %v49_v24  ;;  %v160_v34 = vmax.f32 %v130_v27, 0.0 }
  0xdd   :  { %v132_v30 = vpop.f32.mrf.mxu0 }
  0xde   :  { %v133_v31 = vadd.f32 %v132_v30, %v49_v24  ;;  %v163_v32 = vmax.f32 %v141_v28, 0.0  ;;  %v1195_v28 = vld [vmem:[#allocation2 + $0x90] sm:$0xff]   ;;  %v1197_v30 = vld [vmem:[#allocation2 + $0x80] sm:$0xff]  }
  0xdf   :  { %v1040_v33 = vpop.f32.mrf.mxu0 }
  0xe0   :  { %v161_v35 = vmax.f32 %v133_v31, 0.0  ;;  %v169_v39 = vpack.c.bf16 %v163_v32, %v162_v36  ;;  %v154_v43 = vadd.f32 %v1040_v33, %v49_v24  ;;  %v1198_v31 = vld [vmem:[#allocation2 + $0xf8] sm:$0xff]   ;;  %v1199_v32 = vld [vmem:[#allocation2 + $0xf0] sm:$0xff]   ;;  %v1200_v33 = vld [vmem:[#allocation2 + $0xe8] sm:$0xff]   ;;  %v336_v36 = vsub.s32 2, %v1314_v20 }
  0xe1   :  { %v145_v37 = vpop.f32.mrf.mxu0  ;;  %1114 = vmatprep.subr.bf16.mxu0 %v1198_v31 }
  0xe2   :  { %v168_v38 = vpack.c.bf16 %v161_v35, %v160_v34  ;;  %v146_v41 = vadd.f32 %v145_v37, %v49_v24  ;;  %v166_v49 = vmax.f32 %v154_v43, 0.0  ;;  %v1201_v34 = vld [vmem:[#allocation2 + $0xe0] sm:$0xff]   ;;  %v1202_v35 = vld [vmem:[#allocation2 + $0xd8] sm:$0xff]  }
  0xe3   :  { %v1041_v40 = vpop.f32.mrf.mxu0 }
  0xe4   :  { %v157_v42 = vadd.f32 %v1041_v40, %v49_v24  ;;  %1058 = vmatprep.mubr.bf16.mxu1 %v168_v38  ;;  %v164_v47 = vmax.f32 %v146_v41, 0.0  ;;  %v337_v38 = vrot.slane %v1320_v22, %v336_v36 }
  0xe5   :  { %v148_v44 = vpop.f32.mrf.mxu0  ;;  %1059 = vmatmul.mubr.bf16.vlgmr.msra.gmra.mxu1 %v169_v39 }
  0xe6   :  { %v149_v45 = vadd.f32 %v148_v44, %v49_v24  ;;  %v167_v46 = vmax.f32 %v157_v42, 0.0  ;;  %1091 = vmatpush3.bf16.msra.mxu1 %v1190_v55 }
  0xe7   :  { %1092 = vmatprep.subr.bf16.mxu1 %v1191_v56 }
  0xe8   :  { %v165_v48 = vmax.f32 %v149_v45, 0.0  ;;  %v171_v51 = vpack.c.bf16 %v167_v46, %v166_v49 }
  0xea   :  { %v170_v50 = vpack.c.bf16 %v165_v48, %v164_v47  ;;  %1093 = vmatpush3.bf16.msra.mxu1 %v1191_v56 }
  0xeb   :  { %1094 = vmatprep.subr.bf16.mxu1 %v1192_v57 }
  0xec   :  { %1062 = vmatprep.mubr.bf16.mxu1 %v170_v50 }
  0xed   :  { %1063 = vmatmul.mubr.bf16.gmra.mxu1 %v171_v51 }
  0xee   :  { %1095 = vmatpush3.bf16.msra.mxu1 %v1192_v57 }
  0xef   :  { %1096 = vmatprep.subr.bf16.mxu1 %v1193_v58 }
  0xf2   :  { %1097 = vmatpush3.bf16.msra.mxu1 %v1193_v58 }
  0xf3   :  { %1098 = vmatprep.subr.bf16.mxu1 %v1194_v59 }
  0xf6   :  { %1099 = vmatpush3.bf16.msra.mxu1 %v1194_v59 }
  0xf7   :  { %1100 = vmatprep.subr.bf16.mxu1 %v1195_v28 }
  0xfa   :  { %1101 = vmatpush3.bf16.msra.mxu1 %v1195_v28 }
  0xfb   :  { %1102 = vmatprep.subr.bf16.mxu1 %v1196_v29 }
  0xfe   :  { %1103 = vmatpush3.bf16.msra.mxu1 %v1196_v29 }
  0xff   :  { %1104 = vmatprep.subr.bf16.mxu1 %v1197_v30 }
 0x102   :  { %1105 = vmatpush3.bf16.msra.mxu1 %v1197_v30 }
 0x1a5   :  { %v1060_v61 = vpop.f32.mrf.mxu1 }
 0x1a6   :  { %v283_v3 = vadd.f32 %v1060_v61, %v191_v62 }
 0x1a7   :  { %v274_v63 = vpop.f32.mrf.mxu1 }
 0x1a8   :  { %v275_v1 = vadd.f32 %v274_v63, %v191_v62  ;;  %v307_v10 = vmax.f32 %v283_v3, 0.0  ;;  %v1204_v3 = vld [vmem:[#allocation2 + $0xc8] sm:$0xff]  }
 0x1a9   :  { %v1061_v0 = vpop.f32.mrf.mxu1 }
 0x1aa   :  { %v286_v2 = vadd.f32 %v1061_v0, %v191_v62  ;;  %v305_v8 = vmax.f32 %v275_v1, 0.0 }
 0x1ab   :  { %v277_v4 = vpop.f32.mrf.mxu1 }
 0x1ac   :  { %v278_v5 = vadd.f32 %v277_v4, %v191_v62  ;;  %v308_v6 = vmax.f32 %v286_v2, 0.0  ;;  %v1203_v2 = vld [vmem:[#allocation2 + $0xd0] sm:$0xff]   ;;  %v1205_v4 = vld [vmem:[#allocation2 + $0xc0] sm:$0xff]  }
 0x1ad   :  { %v1064_v7 = vpop.f32.mrf.mxu1 }
 0x1ae   :  { %v306_v9 = vmax.f32 %v278_v5, 0.0  ;;  %v314_v13 = vpack.c.bf16 %v308_v6, %v307_v10  ;;  %v299_v17 = vadd.f32 %v1064_v7, %v191_v62  ;;  %v1206_v5 = vld [vmem:[#allocation2 + $0x138] sm:$0xff]   ;;  %v1207_v6 = vld [vmem:[#allocation2 + $0x130] sm:$0xff]   ;;  %v1208_v7 = vld [vmem:[#allocation2 + $0x128] sm:$0xff]   ;;  %v482_v10 = vsub.s32 3, %v1314_v20 }
 0x1af   :  { %v290_v11 = vpop.f32.mrf.mxu1  ;;  %1138 = vmatprep.subr.bf16.mxu1 %v1206_v5 }
 0x1b0   :  { %v313_v12 = vpack.c.bf16 %v306_v9, %v305_v8  ;;  %v291_v15 = vadd.f32 %v290_v11, %v191_v62  ;;  %v311_v25 = vmax.f32 %v299_v17, 0.0  ;;  %v1209_v8 = vld [vmem:[#allocation2 + $0x120] sm:$0xff]   ;;  %v1210_v9 = vld [vmem:[#allocation2 + $0x118] sm:$0xff]  }
 0x1b1   :  { %v1065_v14 = vpop.f32.mrf.mxu1 }
 0x1b2   :  { %v302_v16 = vadd.f32 %v1065_v14, %v191_v62  ;;  %1082 = vmatprep.mubr.bf16.mxu0 %v313_v12  ;;  %v309_v23 = vmax.f32 %v291_v15, 0.0  ;;  %v483_v12 = vrot.slane %v1320_v22, %v482_v10 }
 0x1b3   :  { %v293_v18 = vpop.f32.mrf.mxu1  ;;  %1083 = vmatmul.mubr.bf16.vlgmr.msra.gmra.mxu0 %v314_v13 }
 0x1b4   :  { %v294_v19 = vadd.f32 %v293_v18, %v191_v62  ;;  %v312_v21 = vmax.f32 %v302_v16, 0.0  ;;  %1115 = vmatpush3.bf16.msra.mxu0 %v1198_v31 }
 0x1b5   :  { %1116 = vmatprep.subr.bf16.mxu0 %v1199_v32 }
 0x1b6   :  { %v310_v24 = vmax.f32 %v294_v19, 0.0  ;;  %v316_v27 = vpack.c.bf16 %v312_v21, %v311_v25 }
 0x1b8   :  { %v315_v26 = vpack.c.bf16 %v310_v24, %v309_v23  ;;  %1117 = vmatpush3.bf16.msra.mxu0 %v1199_v32 }
 0x1b9   :  { %1118 = vmatprep.subr.bf16.mxu0 %v1200_v33 }
 0x1ba   :  { %1086 = vmatprep.mubr.bf16.mxu0 %v315_v26 }
 0x1bb   :  { %1087 = vmatmul.mubr.bf16.gmra.mxu0 %v316_v27 }
 0x1bc   :  { %1119 = vmatpush3.bf16.msra.mxu0 %v1200_v33 }
 0x1bd   :  { %1120 = vmatprep.subr.bf16.mxu0 %v1201_v34 }
 0x1c0   :  { %1121 = vmatpush3.bf16.msra.mxu0 %v1201_v34 }
 0x1c1   :  { %1122 = vmatprep.subr.bf16.mxu0 %v1202_v35 }
 0x1c4   :  { %1123 = vmatpush3.bf16.msra.mxu0 %v1202_v35 }
 0x1c5   :  { %1124 = vmatprep.subr.bf16.mxu0 %v1203_v2 }
 0x1c8   :  { %1125 = vmatpush3.bf16.msra.mxu0 %v1203_v2 }
 0x1c9   :  { %1126 = vmatprep.subr.bf16.mxu0 %v1204_v3 }
 0x1cc   :  { %1127 = vmatpush3.bf16.msra.mxu0 %v1204_v3 }
 0x1cd   :  { %1128 = vmatprep.subr.bf16.mxu0 %v1205_v4 }
 0x1d0   :  { %1129 = vmatpush3.bf16.msra.mxu0 %v1205_v4 }
 0x273   :  { %v1084_v37 = vpop.f32.mrf.mxu0 }
 0x274   :  { %v429_v43 = vadd.f32 %v1084_v37, %v337_v38 }
 0x275   :  { %v420_v39 = vpop.f32.mrf.mxu0 }
 0x276   :  { %v421_v41 = vadd.f32 %v420_v39, %v337_v38  ;;  %v453_v50 = vmax.f32 %v429_v43, 0.0  ;;  %v1212_v43 = vld [vmem:[#allocation2 + $0x108] sm:$0xff]  }
 0x277   :  { %v1085_v40 = vpop.f32.mrf.mxu0 }
 0x278   :  { %v432_v42 = vadd.f32 %v1085_v40, %v337_v38  ;;  %v451_v48 = vmax.f32 %v421_v41, 0.0 }
 0x279   :  { %v423_v44 = vpop.f32.mrf.mxu0 }
 0x27a   :  { %v424_v45 = vadd.f32 %v423_v44, %v337_v38  ;;  %v454_v46 = vmax.f32 %v432_v42, 0.0  ;;  %v1211_v42 = vld [vmem:[#allocation2 + $0x110] sm:$0xff]   ;;  %v1213_v44 = vld [vmem:[#allocation2 + $0x100] sm:$0xff]  }
 0x27b   :  { %v1088_v47 = vpop.f32.mrf.mxu0 }
 0x27c   :  { %v452_v49 = vmax.f32 %v424_v45, 0.0  ;;  %v460_v53 = vpack.c.bf16 %v454_v46, %v453_v50  ;;  %v445_v57 = vadd.f32 %v1088_v47, %v337_v38  ;;  %v628_v45 = vsub.s32 4, %v1314_v20 }
 0x27d   :  { %v436_v51 = vpop.f32.mrf.mxu0 }
 0x27e   :  { %v459_v52 = vpack.c.bf16 %v452_v49, %v451_v48  ;;  %v437_v55 = vadd.f32 %v436_v51, %v337_v38  ;;  %v457_v63 = vmax.f32 %v445_v57, 0.0  ;;  %v629_v47 = vrot.slane %v1320_v22, %v628_v45 }
 0x27f   :  { %v1089_v54 = vpop.f32.mrf.mxu0 }
 0x280   :  { %v448_v56 = vadd.f32 %v1089_v54, %v337_v38  ;;  %1106 = vmatprep.mubr.bf16.mxu1 %v459_v52  ;;  %v455_v61 = vmax.f32 %v437_v55, 0.0 }
 0x281   :  { %v439_v58 = vpop.f32.mrf.mxu0  ;;  %1107 = vmatmul.mubr.bf16.vlgmr.msra.gmra.mxu1 %v460_v53 }
 0x282   :  { %v440_v59 = vadd.f32 %v439_v58, %v337_v38  ;;  %v458_v60 = vmax.f32 %v448_v56, 0.0  ;;  %1139 = vmatpush3.bf16.msra.mxu1 %v1206_v5 }
 0x283   :  { %1140 = vmatprep.subr.bf16.mxu1 %v1207_v6 }
 0x284   :  { %v456_v62 = vmax.f32 %v440_v59, 0.0  ;;  %v462_v1 = vpack.c.bf16 %v458_v60, %v457_v63 }
 0x286   :  { %v461_v0 = vpack.c.bf16 %v456_v62, %v455_v61  ;;  %1141 = vmatpush3.bf16.msra.mxu1 %v1207_v6 }
 0x287   :  { %1142 = vmatprep.subr.bf16.mxu1 %v1208_v7 }
 0x288   :  { %1110 = vmatprep.mubr.bf16.mxu1 %v461_v0 }
 0x289   :  { %1111 = vmatmul.mubr.bf16.gmra.mxu1 %v462_v1 }
 0x28a   :  { %1143 = vmatpush3.bf16.msra.mxu1 %v1208_v7 }
 0x28b   :  { %1144 = vmatprep.subr.bf16.mxu1 %v1209_v8 }
 0x28e   :  { %1145 = vmatpush3.bf16.msra.mxu1 %v1209_v8 }
 0x28f   :  { %1146 = vmatprep.subr.bf16.mxu1 %v1210_v9 }
 0x292   :  { %1147 = vmatpush3.bf16.msra.mxu1 %v1210_v9 }
 0x293   :  { %1148 = vmatprep.subr.bf16.mxu1 %v1211_v42 }
 0x296   :  { %1149 = vmatpush3.bf16.msra.mxu1 %v1211_v42 }
 0x297   :  { %1150 = vmatprep.subr.bf16.mxu1 %v1212_v43 }
 0x29a   :  { %1151 = vmatpush3.bf16.msra.mxu1 %v1212_v43 }
 0x29b   :  { %1152 = vmatprep.subr.bf16.mxu1 %v1213_v44 }
 0x29e   :  { %1153 = vmatpush3.bf16.msra.mxu1 %v1213_v44 }
 0x341   :  { %v1108_v11 = vpop.f32.mrf.mxu1 }
 0x342   :  { %v575_v17 = vadd.f32 %v1108_v11, %v483_v12  ;;  %v774_v11 = vsub.s32 5, %v1314_v20 }
 0x343   :  { %v566_v13 = vpop.f32.mrf.mxu1 }
 0x344   :  { %v567_v15 = vadd.f32 %v566_v13, %v483_v12  ;;  %v599_v26 = vmax.f32 %v575_v17, 0.0 }
 0x345   :  { %v1109_v14 = vpop.f32.mrf.mxu1 }
 0x346   :  { %v578_v16 = vadd.f32 %v1109_v14, %v483_v12  ;;  %v597_v24 = vmax.f32 %v567_v15, 0.0 }
 0x347   :  { %v569_v18 = vpop.f32.mrf.mxu1 }
 0x348   :  { %v570_v19 = vadd.f32 %v569_v18, %v483_v12  ;;  %v600_v21 = vmax.f32 %v578_v16, 0.0 }
 0x349   :  { %v1112_v23 = vpop.f32.mrf.mxu1 }
 0x34a   :  { %v598_v25 = vmax.f32 %v570_v19, 0.0  ;;  %v606_v29 = vpack.c.bf16 %v600_v21, %v599_v26  ;;  %v591_v33 = vadd.f32 %v1112_v23, %v483_v12 }
 0x34b   :  { %v582_v27 = vpop.f32.mrf.mxu1 }
 0x34c   :  { %v605_v28 = vpack.c.bf16 %v598_v25, %v597_v24  ;;  %v583_v31 = vadd.f32 %v582_v27, %v483_v12  ;;  %v603_v39 = vmax.f32 %v591_v33, 0.0 }
 0x34d   :  { %v1113_v30 = vpop.f32.mrf.mxu1 }
 0x34e   :  { %v594_v32 = vadd.f32 %v1113_v30, %v483_v12  ;;  %1130 = vmatprep.mubr.bf16.mxu0 %v605_v28  ;;  %v601_v37 = vmax.f32 %v583_v31, 0.0 }
 0x34f   :  { %v585_v34 = vpop.f32.mrf.mxu1  ;;  %1131 = vmatmul.mubr.bf16.vlgmr.msra.gmra.mxu0 %v606_v29 }
 0x350   :  { %v586_v35 = vadd.f32 %v585_v34, %v483_v12  ;;  %v604_v36 = vmax.f32 %v594_v32, 0.0  ;;  %v775_v12 = vrot.slane %v1320_v22, %v774_v11 }
 0x352   :  { %v602_v38 = vmax.f32 %v586_v35, 0.0  ;;  %v608_v41 = vpack.c.bf16 %v604_v36, %v603_v39 }
 0x354   :  { %v607_v40 = vpack.c.bf16 %v602_v38, %v601_v37 }
 0x356   :  { %1134 = vmatprep.mubr.bf16.mxu0 %v607_v40 }
 0x357   :  { %1135 = vmatmul.mubr.bf16.gmra.mxu0 %v608_v41 }
 0x40f   :  { %v1132_v46 = vpop.f32.mrf.mxu0 }
 0x410   :  { %v721_v52 = vadd.f32 %v1132_v46, %v629_v47 }
 0x411   :  { %v712_v48 = vpop.f32.mrf.mxu0 }
 0x412   :  { %v713_v50 = vadd.f32 %v712_v48, %v629_v47  ;;  %v745_v59 = vmax.f32 %v721_v52, 0.0 }
 0x413   :  { %v1133_v49 = vpop.f32.mrf.mxu0 }
 0x414   :  { %v724_v51 = vadd.f32 %v1133_v49, %v629_v47  ;;  %v743_v57 = vmax.f32 %v713_v50, 0.0 }
 0x415   :  { %v715_v53 = vpop.f32.mrf.mxu0 }
 0x416   :  { %v716_v54 = vadd.f32 %v715_v53, %v629_v47  ;;  %v746_v55 = vmax.f32 %v724_v51, 0.0 }
 0x417   :  { %v1136_v56 = vpop.f32.mrf.mxu0 }
 0x418   :  { %v744_v58 = vmax.f32 %v716_v54, 0.0  ;;  %v752_v62 = vpack.c.bf16 %v746_v55, %v745_v59  ;;  %v737_v2 = vadd.f32 %v1136_v56, %v629_v47 }
 0x419   :  { %v728_v60 = vpop.f32.mrf.mxu0 }
 0x41a   :  { %v751_v61 = vpack.c.bf16 %v744_v58, %v743_v57  ;;  %v729_v0 = vadd.f32 %v728_v60, %v629_v47  ;;  %v749_v8 = vmax.f32 %v737_v2, 0.0 }
 0x41b   :  { %v1137_v63 = vpop.f32.mrf.mxu0 }
 0x41c   :  { %v740_v1 = vadd.f32 %v1137_v63, %v629_v47  ;;  %1154 = vmatprep.mubr.bf16.mxu1 %v751_v61  ;;  %v747_v6 = vmax.f32 %v729_v0, 0.0 }
 0x41d   :  { %v731_v3 = vpop.f32.mrf.mxu0  ;;  %1155 = vmatmul.mubr.bf16.vlgmr.msra.gmra.mxu1 %v752_v62 }
 0x41e   :  { %v732_v4 = vadd.f32 %v731_v3, %v629_v47  ;;  %v750_v5 = vmax.f32 %v740_v1, 0.0 }
 0x420   :  { %v748_v7 = vmax.f32 %v732_v4, 0.0  ;;  %v754_v10 = vpack.c.bf16 %v750_v5, %v749_v8 }
 0x422   :  { %v753_v9 = vpack.c.bf16 %v748_v7, %v747_v6 }
 0x424   :  { %1158 = vmatprep.mubr.bf16.mxu1 %v753_v9 }
 0x425   :  { %1159 = vmatmul.mubr.bf16.gmra.mxu1 %v754_v10 }
 0x4dd   :  { %v1156_v13 = vpop.f32.mrf.mxu1 }
 0x4de   :  { %v867_v14 = vadd.f32 %v1156_v13, %v775_v12 }
 0x4df   :  { %v858_v15 = vpop.f32.mrf.mxu1 }
 0x4e0   :  { %891 = vst [vmem:[#allocation5 + $0x10] sm:$0xff] %v867_v14  ;;  %v859_v16 = vadd.f32 %v858_v15, %v775_v12 }
 0x4e1   :  { %v1157_v17 = vpop.f32.mrf.mxu1 }
 0x4e2   :  { %889 = vst [vmem:[#allocation5] sm:$0xff] %v859_v16  ;;  %v870_v18 = vadd.f32 %v1157_v17, %v775_v12 }
 0x4e3   :  { %v861_v19 = vpop.f32.mrf.mxu1 }
 0x4e4   :  { %892 = vst [vmem:[#allocation5 + $0x18] sm:$0xff] %v870_v18  ;;  %v862_v21 = vadd.f32 %v861_v19, %v775_v12 }
 0x4e5   :  { %v1160_v23 = vpop.f32.mrf.mxu1 }
 0x4e6   :  { %890 = vst [vmem:[#allocation5 + $0x8] sm:$0xff] %v862_v21  ;;  %v883_v24 = vadd.f32 %v1160_v23, %v775_v12 }
 0x4e7   :  { %v874_v25 = vpop.f32.mrf.mxu1 }
 0x4e8   :  { %895 = vst [vmem:[#allocation5 + $0x30] sm:$0xff] %v883_v24  ;;  %v875_v26 = vadd.f32 %v874_v25, %v775_v12 }
 0x4e9   :  { %v1161_v20 = vpop.f32.mrf.mxu1 }
 0x4ea   :  { %893 = vst [vmem:[#allocation5 + $0x20] sm:$0xff] %v875_v26  ;;  %v886_v22 = vadd.f32 %v1161_v20, %v775_v12 }
 0x4eb   :  { %v877_v27 = vpop.f32.mrf.mxu1 }
 0x4ec   :  { %896 = vst [vmem:[#allocation5 + $0x38] sm:$0xff] %v886_v22  ;;  %v878_v28 = vadd.f32 %v877_v27, %v775_v12 }
 0x4ee   :  { %894 = vst [vmem:[#allocation5 + $0x28] sm:$0xff] %v878_v28 }
 0x4ef   :  { %1245 = shalt.err (!%p1242_p9)
}
 0x4f0   :  { %s1262_s9 = smov 128   ;;  %s1263_s10 = smov 8  }
 0x4f1   :  { %908 = dma.vmem_to_hbm [thread:$0]  %s903_s7, 1024, %s1340_s4, [#allocation4], %s1262_s9, %s1262_s9, %s1263_s10  }
 0x4f2   :  { %1256 = dma.done.wait [#allocation4], 1024  }
 0x4f3   :  { %1257 = vsyncadd [#allocation4], 4294966272 }
 0x4f4   :  { %912 = vsyncpa [#allocation3], 1 }
 0x4f5   :  { %913 = vsyncpa [#allocation4], 1 }

</bundles_post_ra>
